<compile_context>
chip_gen: v6e
topology: v6e:2x2x1
jax: 0.10.0
libtpu: 0.0.40
codegen_flags: <defaults>
</compile_context>

<pallas_src>
import functools

import numpy as np
import jax
import jax.numpy as jnp
from jax.experimental import pallas as pl
from jax.experimental.pallas import tpu as pltpu


def _sigmoid(x):
    # tanh-form logistic: runs on the EUP (no Newton-refined divide on the
    # recurrence critical path) and is robust for large |x|.
    return 0.5 * (jnp.tanh(0.5 * x) + 1.0)


def lstm_pool_kernel(
    seqx_ref,                   # (L*B, A)  time-major: rows t*B .. t*B+B-1 = step t
    wih_ref,                    # (A, 4H)   = W_ih.T          (gate order i, f, g, o)
    whh_ref,                    # (H, 4H)   = W_hh.T
    b_ref,                      # (1, 4H)   = b_ih + b_hh
    src_ref,                    # (B, F)
    w1h_ref, w1s_ref, b1_ref,   # (F, F), (F, F), (1, F)  merger fc1, split by concat block
    w2_ref, b2_ref,             # (F, F), (1, F)          merger fc2
    out_ref,                    # (B, F)
    *, L, B, H,
):
    # ---- Hoisted input projection: all L time steps in ONE MXU matmul. ----
    gates_x = (
        jnp.dot(seqx_ref[...], wih_ref[...], preferred_element_type=jnp.float32)
        + b_ref[...]
    )                                                    # (L*B, 4H), lane-dense

    whh = whh_ref[...]                                   # invariant load, read once

    h = jnp.zeros((B, H), jnp.float32)
    c = jnp.zeros((B, H), jnp.float32)

    # ---- Recurrence, fully unrolled at trace time (L is a static Python int).
    # Equivalent to lax.fori_loop(0, L, ..., unroll=True); h/c live in vregs
    # (no VMEM store->load on the serial dependence chain).
    for t in range(L):
        gates = gates_x[t * B:(t + 1) * B, :] + jnp.dot(
            h, whh, preferred_element_type=jnp.float32)   # (B, 4H)
        sig = _sigmoid(gates)                             # full-slab EUP (i, f, o)
        tnh = jnp.tanh(gates)                             # full-slab EUP (g)
        i_g = sig[:, 0 * H:1 * H]
        f_g = sig[:, 1 * H:2 * H]
        g_g = tnh[:, 2 * H:3 * H]
        o_g = sig[:, 3 * H:4 * H]
        c = f_g * c + i_g * g_g
        h = o_g * jnp.tanh(c)

    # ---- MergeLayer: fc2(relu(fc1(cat([hn, src], 1)))), fc1 pre-split so the
    # concat is never materialized and hn never round-trips to HBM.
    hid = (
        jnp.dot(h, w1h_ref[...], preferred_element_type=jnp.float32)
        + jnp.dot(src_ref[...], w1s_ref[...], preferred_element_type=jnp.float32)
        + b1_ref[...]
    )
    hid = jnp.maximum(hid, 0.0)
    out = jnp.dot(hid, w2_ref[...], preferred_element_type=jnp.float32) + b2_ref[...]
    out_ref[...] = out.astype(out_ref.dtype)


def lstm_pool(src, src_t, seq, seq_t, seq_e, mask,
              w_ih, w_hh, b_ih, b_hh, w1, b1, w2, b2):
    """Pallas LSTMPool forward. Returns (out, None) like the PyTorch module."""
    del src_t, mask  # unused by the PyTorch forward (kept for signature fidelity)

    B, L, F = seq.shape
    E = seq_e.shape[-1]
    T = seq_t.shape[-1]
    A = F + E + T
    H = w_hh.shape[1]          # hidden size == feat_dim
    assert w_ih.shape == (4 * H, A) and w_hh.shape == (4 * H, H)

    f32 = jnp.float32

    # Time-major, flattened so row t*B + b is (time t, batch b). One-time XLA
    # concat/transpose in the wrapper; the kernel never materializes a concat.
    seq_x = jnp.concatenate([seq, seq_e, seq_t], axis=2)              # (B, L, A)
    seqx_tm = jnp.transpose(seq_x, (1, 0, 2)).reshape(L * B, A).astype(f32)

    # Pre-transpose / split weights so every in-kernel matmul is row-major onto
    # the lane-dense 4H axis.
    wih_T = w_ih.T.astype(f32)                    # (A, 4H)
    whh_T = w_hh.T.astype(f32)                    # (H, 4H)
    b = (b_ih + b_hh).reshape(1, 4 * H).astype(f32)
    w1h_T = w1[:, :F].T.astype(f32)               # (F, F)   multiplies hn
    w1s_T = w1[:, F:].T.astype(f32)               # (F, F)   multiplies src
    b1_2d = b1.reshape(1, F).astype(f32)
    w2_T = w2.T.astype(f32)                       # (F, F)
    b2_2d = b2.reshape(1, F).astype(f32)
    src_f32 = src.astype(f32)

    cost = pl.CostEstimate(
        flops=int(2 * L * B * 4 * H * (A + H) + 10 * L * B * H + 6 * B * F * F),
        transcendentals=int(9 * L * B * H),
        bytes_accessed=int(4 * (seqx_tm.size + src.size + w_ih.size + w_hh.size
                                + 4 * H + w1.size + w2.size + 2 * F + B * F)),
    )

    vmem = pltpu.MemorySpace.VMEM
    out = pl.pallas_call(
        functools.partial(lstm_pool_kernel, L=L, B=B, H=H),
        out_shape=jax.ShapeDtypeStruct((B, F), f32),
        in_specs=[pl.BlockSpec(memory_space=vmem)] * 10,   # whole arrays resident in VMEM
        out_specs=pl.BlockSpec(memory_space=vmem),
        cost_estimate=cost,
    )(seqx_tm, wih_T, whh_T, b, src_f32,
      w1h_T, w1s_T, b1_2d, w2_T, b2_2d)
    return out, None


def lstm_pool_reference(src, seq, seq_t, seq_e,
                        w_ih, w_hh, b_ih, b_hh, w1, b1, w2, b2):
    """Pure-JAX reference mirroring the PyTorch module."""
    B, L, _ = seq.shape
    H = w_hh.shape[1]
    seq_x = jnp.concatenate([seq, seq_e, seq_t], axis=2)   # (B, L, A)
    h = jnp.zeros((B, H), jnp.float32)
    c = jnp.zeros((B, H), jnp.float32)
    for t in range(L):
        x_t = seq_x[:, t, :]
        gates = (jnp.dot(x_t, w_ih.T, preferred_element_type=jnp.float32) + b_ih
                 + jnp.dot(h, w_hh.T, preferred_element_type=jnp.float32) + b_hh)
        i = jax.nn.sigmoid(gates[:, 0 * H:1 * H])
        f = jax.nn.sigmoid(gates[:, 1 * H:2 * H])
        g = jnp.tanh(gates[:, 2 * H:3 * H])
        o = jax.nn.sigmoid(gates[:, 3 * H:4 * H])
        c = f * c + i * g
        h = o * jnp.tanh(c)
    x = jnp.concatenate([h, src], axis=1)
    hid = jnp.maximum(jnp.dot(x, w1.T, preferred_element_type=jnp.float32) + b1, 0.0)
    return jnp.dot(hid, w2.T, preferred_element_type=jnp.float32) + b2


if __name__ == "__main__":
    # Module hyper-params (small, consistent with LSTMPool(feat, edge, time)).
    feat_dim, edge_dim, time_dim = 32, 32, 32
    B, L = 2, 8
    H = feat_dim
    A = feat_dim + edge_dim + time_dim

    key = jax.random.PRNGKey(0)
    ks = jax.random.split(key, 13)
    scale = 0.1

    # Inputs (src_t and mask are unused by the forward, as in PyTorch).
    src = jax.random.normal(ks[0], (B, feat_dim), jnp.float32)
    src_t = jax.random.normal(ks[1], (B, 1, time_dim), jnp.float32)
    seq = jax.random.normal(ks[2], (B, L, feat_dim), jnp.float32)
    seq_t = jax.random.normal(ks[3], (B, L, time_dim), jnp.float32)
    seq_e = jax.random.normal(ks[4], (B, L, edge_dim), jnp.float32)
    mask = jnp.zeros((B, L), jnp.float32)

    # Synthetic deterministic parameters (PyTorch layout: W_ih (4H, A), gates i,f,g,o).
    w_ih = scale * jax.random.normal(ks[5], (4 * H, A), jnp.float32)
    w_hh = scale * jax.random.normal(ks[6], (4 * H, H), jnp.float32)
    b_ih = scale * jax.random.normal(ks[7], (4 * H,), jnp.float32)
    b_hh = scale * jax.random.normal(ks[8], (4 * H,), jnp.float32)
    w1 = scale * jax.random.normal(ks[9], (feat_dim, 2 * feat_dim), jnp.float32)
    b1 = scale * jax.random.normal(ks[10], (feat_dim,), jnp.float32)
    w2 = scale * jax.random.normal(ks[11], (feat_dim, feat_dim), jnp.float32)
    b2 = scale * jax.random.normal(ks[12], (feat_dim,), jnp.float32)

    out, aux = lstm_pool(src, src_t, seq, seq_t, seq_e, mask,
                         w_ih, w_hh, b_ih, b_hh, w1, b1, w2, b2)
    out = jax.block_until_ready(out)

    ref = lstm_pool_reference(src, seq, seq_t, seq_e,
                              w_ih, w_hh, b_ih, b_hh, w1, b1, w2, b2)

    assert aux is None
    assert out.shape == (B, feat_dim)
    assert out.dtype == jnp.float32
    np.testing.assert_allclose(np.asarray(out), np.asarray(ref),
                               rtol=1e-4, atol=1e-4)
    print("KERNEL_OK")
</pallas_src>

<mosaic_0001>
module attributes {stable_mosaic.version = 11 : i64} {
  func.func @lstm_pool_kernel(%arg0: memref<16x96xf32, #tpu.memory_space<vmem>>, %arg1: memref<96x128xf32, #tpu.memory_space<vmem>>, %arg2: memref<32x128xf32, #tpu.memory_space<vmem>>, %arg3: memref<1x128xf32, #tpu.memory_space<vmem>>, %arg4: memref<2x32xf32, #tpu.memory_space<vmem>>, %arg5: memref<32x32xf32, #tpu.memory_space<vmem>>, %arg6: memref<32x32xf32, #tpu.memory_space<vmem>>, %arg7: memref<1x32xf32, #tpu.memory_space<vmem>>, %arg8: memref<32x32xf32, #tpu.memory_space<vmem>>, %arg9: memref<1x32xf32, #tpu.memory_space<vmem>>, %arg10: memref<2x32xf32, #tpu.memory_space<vmem>>) attributes {dimension_semantics = [], scalar_prefetch = 0 : i64, scratch_operands = 0 : i64, tpu.core_type = #tpu.core_type<tc>} {
    %c0 = arith.constant 0 : index
    %c0_0 = arith.constant 0 : index
    %0 = vector.load %arg0[%c0, %c0_0] : memref<16x96xf32, #tpu.memory_space<vmem>>, vector<16x96xf32>
    %c0_1 = arith.constant 0 : index
    %c0_2 = arith.constant 0 : index
    %1 = vector.load %arg1[%c0_1, %c0_2] : memref<96x128xf32, #tpu.memory_space<vmem>>, vector<96x128xf32>
    %cst = arith.constant dense<0.000000e+00> : vector<16x128xf32>
    %2 = tpu.matmul %0, %1, %cst {dimension_numbers = #tpu.dot_dimension_numbers<[1], [0], [0], [1], [0, 0, 1, 1], [], []>} : vector<16x96xf32>, vector<96x128xf32>, vector<16x128xf32> -> vector<16x128xf32>
    %c0_3 = arith.constant 0 : index
    %c0_4 = arith.constant 0 : index
    %3 = vector.load %arg3[%c0_3, %c0_4] : memref<1x128xf32, #tpu.memory_space<vmem>>, vector<1x128xf32>
    %4 = vector.broadcast %3 : vector<1x128xf32> to vector<16x128xf32>
    %5 = arith.addf %2, %4 : vector<16x128xf32>
    %c0_5 = arith.constant 0 : index
    %c0_6 = arith.constant 0 : index
    %6 = vector.load %arg2[%c0_5, %c0_6] : memref<32x128xf32, #tpu.memory_space<vmem>>, vector<32x128xf32>
    %cst_7 = arith.constant 0.000000e+00 : f32
    %7 = vector.broadcast %cst_7 : f32 to vector<2x32xf32>
    %cst_8 = arith.constant 0.000000e+00 : f32
    %8 = vector.broadcast %cst_8 : f32 to vector<2x32xf32>
    %9 = vector.extract_strided_slice %5 {offsets = [0, 0], sizes = [2, 128], strides = [1, 1]} : vector<16x128xf32> to vector<2x128xf32>
    %cst_9 = arith.constant dense<0.000000e+00> : vector<2x128xf32>
    %10 = tpu.matmul %7, %6, %cst_9 {dimension_numbers = #tpu.dot_dimension_numbers<[1], [0], [0], [1], [0, 0, 1, 1], [], []>} : vector<2x32xf32>, vector<32x128xf32>, vector<2x128xf32> -> vector<2x128xf32>
    %11 = arith.addf %9, %10 : vector<2x128xf32>
    %cst_10 = arith.constant 5.000000e-01 : f32
    %12 = vector.broadcast %cst_10 : f32 to vector<2x128xf32>
    %13 = arith.mulf %12, %11 : vector<2x128xf32>
    %14 = math.tanh %13 : vector<2x128xf32>
    %cst_11 = arith.constant 1.000000e+00 : f32
    %15 = vector.broadcast %cst_11 : f32 to vector<2x128xf32>
    %16 = arith.addf %14, %15 : vector<2x128xf32>
    %cst_12 = arith.constant 5.000000e-01 : f32
    %17 = vector.broadcast %cst_12 : f32 to vector<2x128xf32>
    %18 = arith.mulf %17, %16 : vector<2x128xf32>
    %19 = math.tanh %11 : vector<2x128xf32>
    %20 = vector.extract_strided_slice %18 {offsets = [0, 0], sizes = [2, 32], strides = [1, 1]} : vector<2x128xf32> to vector<2x32xf32>
    %21 = vector.extract_strided_slice %18 {offsets = [0, 32], sizes = [2, 32], strides = [1, 1]} : vector<2x128xf32> to vector<2x32xf32>
    %22 = vector.extract_strided_slice %19 {offsets = [0, 64], sizes = [2, 32], strides = [1, 1]} : vector<2x128xf32> to vector<2x32xf32>
    %23 = vector.extract_strided_slice %18 {offsets = [0, 96], sizes = [2, 32], strides = [1, 1]} : vector<2x128xf32> to vector<2x32xf32>
    %24 = arith.mulf %21, %8 : vector<2x32xf32>
    %25 = arith.mulf %20, %22 : vector<2x32xf32>
    %26 = arith.addf %24, %25 : vector<2x32xf32>
    %27 = math.tanh %26 : vector<2x32xf32>
    %28 = arith.mulf %23, %27 : vector<2x32xf32>
    %29 = vector.extract_strided_slice %5 {offsets = [2, 0], sizes = [2, 128], strides = [1, 1]} : vector<16x128xf32> to vector<2x128xf32>
    %cst_13 = arith.constant dense<0.000000e+00> : vector<2x128xf32>
    %30 = tpu.matmul %28, %6, %cst_13 {dimension_numbers = #tpu.dot_dimension_numbers<[1], [0], [0], [1], [0, 0, 1, 1], [], []>} : vector<2x32xf32>, vector<32x128xf32>, vector<2x128xf32> -> vector<2x128xf32>
    %31 = arith.addf %29, %30 : vector<2x128xf32>
    %cst_14 = arith.constant 5.000000e-01 : f32
    %32 = vector.broadcast %cst_14 : f32 to vector<2x128xf32>
    %33 = arith.mulf %32, %31 : vector<2x128xf32>
    %34 = math.tanh %33 : vector<2x128xf32>
    %cst_15 = arith.constant 1.000000e+00 : f32
    %35 = vector.broadcast %cst_15 : f32 to vector<2x128xf32>
    %36 = arith.addf %34, %35 : vector<2x128xf32>
    %cst_16 = arith.constant 5.000000e-01 : f32
    %37 = vector.broadcast %cst_16 : f32 to vector<2x128xf32>
    %38 = arith.mulf %37, %36 : vector<2x128xf32>
    %39 = math.tanh %31 : vector<2x128xf32>
    %40 = vector.extract_strided_slice %38 {offsets = [0, 0], sizes = [2, 32], strides = [1, 1]} : vector<2x128xf32> to vector<2x32xf32>
    %41 = vector.extract_strided_slice %38 {offsets = [0, 32], sizes = [2, 32], strides = [1, 1]} : vector<2x128xf32> to vector<2x32xf32>
    %42 = vector.extract_strided_slice %39 {offsets = [0, 64], sizes = [2, 32], strides = [1, 1]} : vector<2x128xf32> to vector<2x32xf32>
    %43 = vector.extract_strided_slice %38 {offsets = [0, 96], sizes = [2, 32], strides = [1, 1]} : vector<2x128xf32> to vector<2x32xf32>
    %44 = arith.mulf %41, %26 : vector<2x32xf32>
    %45 = arith.mulf %40, %42 : vector<2x32xf32>
    %46 = arith.addf %44, %45 : vector<2x32xf32>
    %47 = math.tanh %46 : vector<2x32xf32>
    %48 = arith.mulf %43, %47 : vector<2x32xf32>
    %49 = vector.extract_strided_slice %5 {offsets = [4, 0], sizes = [2, 128], strides = [1, 1]} : vector<16x128xf32> to vector<2x128xf32>
    %cst_17 = arith.constant dense<0.000000e+00> : vector<2x128xf32>
    %50 = tpu.matmul %48, %6, %cst_17 {dimension_numbers = #tpu.dot_dimension_numbers<[1], [0], [0], [1], [0, 0, 1, 1], [], []>} : vector<2x32xf32>, vector<32x128xf32>, vector<2x128xf32> -> vector<2x128xf32>
    %51 = arith.addf %49, %50 : vector<2x128xf32>
    %cst_18 = arith.constant 5.000000e-01 : f32
    %52 = vector.broadcast %cst_18 : f32 to vector<2x128xf32>
    %53 = arith.mulf %52, %51 : vector<2x128xf32>
    %54 = math.tanh %53 : vector<2x128xf32>
    %cst_19 = arith.constant 1.000000e+00 : f32
    %55 = vector.broadcast %cst_19 : f32 to vector<2x128xf32>
    %56 = arith.addf %54, %55 : vector<2x128xf32>
    %cst_20 = arith.constant 5.000000e-01 : f32
    %57 = vector.broadcast %cst_20 : f32 to vector<2x128xf32>
    %58 = arith.mulf %57, %56 : vector<2x128xf32>
    %59 = math.tanh %51 : vector<2x128xf32>
    %60 = vector.extract_strided_slice %58 {offsets = [0, 0], sizes = [2, 32], strides = [1, 1]} : vector<2x128xf32> to vector<2x32xf32>
    %61 = vector.extract_strided_slice %58 {offsets = [0, 32], sizes = [2, 32], strides = [1, 1]} : vector<2x128xf32> to vector<2x32xf32>
    %62 = vector.extract_strided_slice %59 {offsets = [0, 64], sizes = [2, 32], strides = [1, 1]} : vector<2x128xf32> to vector<2x32xf32>
    %63 = vector.extract_strided_slice %58 {offsets = [0, 96], sizes = [2, 32], strides = [1, 1]} : vector<2x128xf32> to vector<2x32xf32>
    %64 = arith.mulf %61, %46 : vector<2x32xf32>
    %65 = arith.mulf %60, %62 : vector<2x32xf32>
    %66 = arith.addf %64, %65 : vector<2x32xf32>
    %67 = math.tanh %66 : vector<2x32xf32>
    %68 = arith.mulf %63, %67 : vector<2x32xf32>
    %69 = vector.extract_strided_slice %5 {offsets = [6, 0], sizes = [2, 128], strides = [1, 1]} : vector<16x128xf32> to vector<2x128xf32>
    %cst_21 = arith.constant dense<0.000000e+00> : vector<2x128xf32>
    %70 = tpu.matmul %68, %6, %cst_21 {dimension_numbers = #tpu.dot_dimension_numbers<[1], [0], [0], [1], [0, 0, 1, 1], [], []>} : vector<2x32xf32>, vector<32x128xf32>, vector<2x128xf32> -> vector<2x128xf32>
    %71 = arith.addf %69, %70 : vector<2x128xf32>
    %cst_22 = arith.constant 5.000000e-01 : f32
    %72 = vector.broadcast %cst_22 : f32 to vector<2x128xf32>
    %73 = arith.mulf %72, %71 : vector<2x128xf32>
    %74 = math.tanh %73 : vector<2x128xf32>
    %cst_23 = arith.constant 1.000000e+00 : f32
    %75 = vector.broadcast %cst_23 : f32 to vector<2x128xf32>
    %76 = arith.addf %74, %75 : vector<2x128xf32>
    %cst_24 = arith.constant 5.000000e-01 : f32
    %77 = vector.broadcast %cst_24 : f32 to vector<2x128xf32>
    %78 = arith.mulf %77, %76 : vector<2x128xf32>
    %79 = math.tanh %71 : vector<2x128xf32>
    %80 = vector.extract_strided_slice %78 {offsets = [0, 0], sizes = [2, 32], strides = [1, 1]} : vector<2x128xf32> to vector<2x32xf32>
    %81 = vector.extract_strided_slice %78 {offsets = [0, 32], sizes = [2, 32], strides = [1, 1]} : vector<2x128xf32> to vector<2x32xf32>
    %82 = vector.extract_strided_slice %79 {offsets = [0, 64], sizes = [2, 32], strides = [1, 1]} : vector<2x128xf32> to vector<2x32xf32>
    %83 = vector.extract_strided_slice %78 {offsets = [0, 96], sizes = [2, 32], strides = [1, 1]} : vector<2x128xf32> to vector<2x32xf32>
    %84 = arith.mulf %81, %66 : vector<2x32xf32>
    %85 = arith.mulf %80, %82 : vector<2x32xf32>
    %86 = arith.addf %84, %85 : vector<2x32xf32>
    %87 = math.tanh %86 : vector<2x32xf32>
    %88 = arith.mulf %83, %87 : vector<2x32xf32>
    %89 = vector.extract_strided_slice %5 {offsets = [8, 0], sizes = [2, 128], strides = [1, 1]} : vector<16x128xf32> to vector<2x128xf32>
    %cst_25 = arith.constant dense<0.000000e+00> : vector<2x128xf32>
    %90 = tpu.matmul %88, %6, %cst_25 {dimension_numbers = #tpu.dot_dimension_numbers<[1], [0], [0], [1], [0, 0, 1, 1], [], []>} : vector<2x32xf32>, vector<32x128xf32>, vector<2x128xf32> -> vector<2x128xf32>
    %91 = arith.addf %89, %90 : vector<2x128xf32>
    %cst_26 = arith.constant 5.000000e-01 : f32
    %92 = vector.broadcast %cst_26 : f32 to vector<2x128xf32>
    %93 = arith.mulf %92, %91 : vector<2x128xf32>
    %94 = math.tanh %93 : vector<2x128xf32>
    %cst_27 = arith.constant 1.000000e+00 : f32
    %95 = vector.broadcast %cst_27 : f32 to vector<2x128xf32>
    %96 = arith.addf %94, %95 : vector<2x128xf32>
    %cst_28 = arith.constant 5.000000e-01 : f32
    %97 = vector.broadcast %cst_28 : f32 to vector<2x128xf32>
    %98 = arith.mulf %97, %96 : vector<2x128xf32>
    %99 = math.tanh %91 : vector<2x128xf32>
    %100 = vector.extract_strided_slice %98 {offsets = [0, 0], sizes = [2, 32], strides = [1, 1]} : vector<2x128xf32> to vector<2x32xf32>
    %101 = vector.extract_strided_slice %98 {offsets = [0, 32], sizes = [2, 32], strides = [1, 1]} : vector<2x128xf32> to vector<2x32xf32>
    %102 = vector.extract_strided_slice %99 {offsets = [0, 64], sizes = [2, 32], strides = [1, 1]} : vector<2x128xf32> to vector<2x32xf32>
    %103 = vector.extract_strided_slice %98 {offsets = [0, 96], sizes = [2, 32], strides = [1, 1]} : vector<2x128xf32> to vector<2x32xf32>
    %104 = arith.mulf %101, %86 : vector<2x32xf32>
    %105 = arith.mulf %100, %102 : vector<2x32xf32>
    %106 = arith.addf %104, %105 : vector<2x32xf32>
    %107 = math.tanh %106 : vector<2x32xf32>
    %108 = arith.mulf %103, %107 : vector<2x32xf32>
    %109 = vector.extract_strided_slice %5 {offsets = [10, 0], sizes = [2, 128], strides = [1, 1]} : vector<16x128xf32> to vector<2x128xf32>
    %cst_29 = arith.constant dense<0.000000e+00> : vector<2x128xf32>
    %110 = tpu.matmul %108, %6, %cst_29 {dimension_numbers = #tpu.dot_dimension_numbers<[1], [0], [0], [1], [0, 0, 1, 1], [], []>} : vector<2x32xf32>, vector<32x128xf32>, vector<2x128xf32> -> vector<2x128xf32>
    %111 = arith.addf %109, %110 : vector<2x128xf32>
    %cst_30 = arith.constant 5.000000e-01 : f32
    %112 = vector.broadcast %cst_30 : f32 to vector<2x128xf32>
    %113 = arith.mulf %112, %111 : vector<2x128xf32>
    %114 = math.tanh %113 : vector<2x128xf32>
    %cst_31 = arith.constant 1.000000e+00 : f32
    %115 = vector.broadcast %cst_31 : f32 to vector<2x128xf32>
    %116 = arith.addf %114, %115 : vector<2x128xf32>
    %cst_32 = arith.constant 5.000000e-01 : f32
    %117 = vector.broadcast %cst_32 : f32 to vector<2x128xf32>
    %118 = arith.mulf %117, %116 : vector<2x128xf32>
    %119 = math.tanh %111 : vector<2x128xf32>
    %120 = vector.extract_strided_slice %118 {offsets = [0, 0], sizes = [2, 32], strides = [1, 1]} : vector<2x128xf32> to vector<2x32xf32>
    %121 = vector.extract_strided_slice %118 {offsets = [0, 32], sizes = [2, 32], strides = [1, 1]} : vector<2x128xf32> to vector<2x32xf32>
    %122 = vector.extract_strided_slice %119 {offsets = [0, 64], sizes = [2, 32], strides = [1, 1]} : vector<2x128xf32> to vector<2x32xf32>
    %123 = vector.extract_strided_slice %118 {offsets = [0, 96], sizes = [2, 32], strides = [1, 1]} : vector<2x128xf32> to vector<2x32xf32>
    %124 = arith.mulf %121, %106 : vector<2x32xf32>
    %125 = arith.mulf %120, %122 : vector<2x32xf32>
    %126 = arith.addf %124, %125 : vector<2x32xf32>
    %127 = math.tanh %126 : vector<2x32xf32>
    %128 = arith.mulf %123, %127 : vector<2x32xf32>
    %129 = vector.extract_strided_slice %5 {offsets = [12, 0], sizes = [2, 128], strides = [1, 1]} : vector<16x128xf32> to vector<2x128xf32>
    %cst_33 = arith.constant dense<0.000000e+00> : vector<2x128xf32>
    %130 = tpu.matmul %128, %6, %cst_33 {dimension_numbers = #tpu.dot_dimension_numbers<[1], [0], [0], [1], [0, 0, 1, 1], [], []>} : vector<2x32xf32>, vector<32x128xf32>, vector<2x128xf32> -> vector<2x128xf32>
    %131 = arith.addf %129, %130 : vector<2x128xf32>
    %cst_34 = arith.constant 5.000000e-01 : f32
    %132 = vector.broadcast %cst_34 : f32 to vector<2x128xf32>
    %133 = arith.mulf %132, %131 : vector<2x128xf32>
    %134 = math.tanh %133 : vector<2x128xf32>
    %cst_35 = arith.constant 1.000000e+00 : f32
    %135 = vector.broadcast %cst_35 : f32 to vector<2x128xf32>
    %136 = arith.addf %134, %135 : vector<2x128xf32>
    %cst_36 = arith.constant 5.000000e-01 : f32
    %137 = vector.broadcast %cst_36 : f32 to vector<2x128xf32>
    %138 = arith.mulf %137, %136 : vector<2x128xf32>
    %139 = math.tanh %131 : vector<2x128xf32>
    %140 = vector.extract_strided_slice %138 {offsets = [0, 0], sizes = [2, 32], strides = [1, 1]} : vector<2x128xf32> to vector<2x32xf32>
    %141 = vector.extract_strided_slice %138 {offsets = [0, 32], sizes = [2, 32], strides = [1, 1]} : vector<2x128xf32> to vector<2x32xf32>
    %142 = vector.extract_strided_slice %139 {offsets = [0, 64], sizes = [2, 32], strides = [1, 1]} : vector<2x128xf32> to vector<2x32xf32>
    %143 = vector.extract_strided_slice %138 {offsets = [0, 96], sizes = [2, 32], strides = [1, 1]} : vector<2x128xf32> to vector<2x32xf32>
    %144 = arith.mulf %141, %126 : vector<2x32xf32>
    %145 = arith.mulf %140, %142 : vector<2x32xf32>
    %146 = arith.addf %144, %145 : vector<2x32xf32>
    %147 = math.tanh %146 : vector<2x32xf32>
    %148 = arith.mulf %143, %147 : vector<2x32xf32>
    %149 = vector.extract_strided_slice %5 {offsets = [14, 0], sizes = [2, 128], strides = [1, 1]} : vector<16x128xf32> to vector<2x128xf32>
    %cst_37 = arith.constant dense<0.000000e+00> : vector<2x128xf32>
    %150 = tpu.matmul %148, %6, %cst_37 {dimension_numbers = #tpu.dot_dimension_numbers<[1], [0], [0], [1], [0, 0, 1, 1], [], []>} : vector<2x32xf32>, vector<32x128xf32>, vector<2x128xf32> -> vector<2x128xf32>
    %151 = arith.addf %149, %150 : vector<2x128xf32>
    %cst_38 = arith.constant 5.000000e-01 : f32
    %152 = vector.broadcast %cst_38 : f32 to vector<2x128xf32>
    %153 = arith.mulf %152, %151 : vector<2x128xf32>
    %154 = math.tanh %153 : vector<2x128xf32>
    %cst_39 = arith.constant 1.000000e+00 : f32
    %155 = vector.broadcast %cst_39 : f32 to vector<2x128xf32>
    %156 = arith.addf %154, %155 : vector<2x128xf32>
    %cst_40 = arith.constant 5.000000e-01 : f32
    %157 = vector.broadcast %cst_40 : f32 to vector<2x128xf32>
    %158 = arith.mulf %157, %156 : vector<2x128xf32>
    %159 = math.tanh %151 : vector<2x128xf32>
    %160 = vector.extract_strided_slice %158 {offsets = [0, 0], sizes = [2, 32], strides = [1, 1]} : vector<2x128xf32> to vector<2x32xf32>
    %161 = vector.extract_strided_slice %158 {offsets = [0, 32], sizes = [2, 32], strides = [1, 1]} : vector<2x128xf32> to vector<2x32xf32>
    %162 = vector.extract_strided_slice %159 {offsets = [0, 64], sizes = [2, 32], strides = [1, 1]} : vector<2x128xf32> to vector<2x32xf32>
    %163 = vector.extract_strided_slice %158 {offsets = [0, 96], sizes = [2, 32], strides = [1, 1]} : vector<2x128xf32> to vector<2x32xf32>
    %164 = arith.mulf %161, %146 : vector<2x32xf32>
    %165 = arith.mulf %160, %162 : vector<2x32xf32>
    %166 = arith.addf %164, %165 : vector<2x32xf32>
    %167 = math.tanh %166 : vector<2x32xf32>
    %168 = arith.mulf %163, %167 : vector<2x32xf32>
    %c0_41 = arith.constant 0 : index
    %c0_42 = arith.constant 0 : index
    %169 = vector.load %arg5[%c0_41, %c0_42] : memref<32x32xf32, #tpu.memory_space<vmem>>, vector<32x32xf32>
    %cst_43 = arith.constant dense<0.000000e+00> : vector<2x32xf32>
    %170 = tpu.matmul %168, %169, %cst_43 {dimension_numbers = #tpu.dot_dimension_numbers<[1], [0], [0], [1], [0, 0, 1, 1], [], []>} : vector<2x32xf32>, vector<32x32xf32>, vector<2x32xf32> -> vector<2x32xf32>
    %c0_44 = arith.constant 0 : index
    %c0_45 = arith.constant 0 : index
    %171 = vector.load %arg4[%c0_44, %c0_45] : memref<2x32xf32, #tpu.memory_space<vmem>>, vector<2x32xf32>
    %c0_46 = arith.constant 0 : index
    %c0_47 = arith.constant 0 : index
    %172 = vector.load %arg6[%c0_46, %c0_47] : memref<32x32xf32, #tpu.memory_space<vmem>>, vector<32x32xf32>
    %cst_48 = arith.constant dense<0.000000e+00> : vector<2x32xf32>
    %173 = tpu.matmul %171, %172, %cst_48 {dimension_numbers = #tpu.dot_dimension_numbers<[1], [0], [0], [1], [0, 0, 1, 1], [], []>} : vector<2x32xf32>, vector<32x32xf32>, vector<2x32xf32> -> vector<2x32xf32>
    %174 = arith.addf %170, %173 : vector<2x32xf32>
    %c0_49 = arith.constant 0 : index
    %c0_50 = arith.constant 0 : index
    %175 = vector.load %arg7[%c0_49, %c0_50] : memref<1x32xf32, #tpu.memory_space<vmem>>, vector<1x32xf32>
    %176 = vector.broadcast %175 : vector<1x32xf32> to vector<2x32xf32>
    %177 = arith.addf %174, %176 : vector<2x32xf32>
    %cst_51 = arith.constant 0.000000e+00 : f32
    %178 = vector.broadcast %cst_51 : f32 to vector<2x32xf32>
    %179 = arith.maximumf %177, %178 : vector<2x32xf32>
    %c0_52 = arith.constant 0 : index
    %c0_53 = arith.constant 0 : index
    %180 = vector.load %arg8[%c0_52, %c0_53] : memref<32x32xf32, #tpu.memory_space<vmem>>, vector<32x32xf32>
    %cst_54 = arith.constant dense<0.000000e+00> : vector<2x32xf32>
    %181 = tpu.matmul %179, %180, %cst_54 {dimension_numbers = #tpu.dot_dimension_numbers<[1], [0], [0], [1], [0, 0, 1, 1], [], []>} : vector<2x32xf32>, vector<32x32xf32>, vector<2x32xf32> -> vector<2x32xf32>
    %c0_55 = arith.constant 0 : index
    %c0_56 = arith.constant 0 : index
    %182 = vector.load %arg9[%c0_55, %c0_56] : memref<1x32xf32, #tpu.memory_space<vmem>>, vector<1x32xf32>
    %183 = vector.broadcast %182 : vector<1x32xf32> to vector<2x32xf32>
    %184 = arith.addf %181, %183 : vector<2x32xf32>
    %c0_57 = arith.constant 0 : index
    %c0_58 = arith.constant 0 : index
    %185 = vector.load %arg10[%c0_57, %c0_58] : memref<2x32xf32, #tpu.memory_space<vmem>>, vector<2x32xf32>
    tpu.vector_store %arg10[%c0_57, %c0_58], %184 {strides = array<i32>} : memref<2x32xf32, #tpu.memory_space<vmem>>, vector<2x32xf32>,
    return
  }
}

</mosaic_0001>

<bundles_post_ra>
// kernel: tpu_custom_call.1
= control target key start
LH: loop header
LB: loop body
LE: loop exit
PB: predicated region body
PF: predicated region fallthrough
CT: control target
= control target key end

     0   :  { %15 = vsyncpa [#allocation3], 0  ;;  %s2048_s0 = inlined_call_operand.hbm [shape: f32[16,96], index: 0, kind: input, shape index: {}]   ;;  %s2049_s1 = inlined_call_operand.hbm [shape: f32[96,128], index: 1, kind: input, shape index: {}]   ;;  %s2050_s2 = inlined_call_operand.hbm [shape: f32[32,128], index: 2, kind: input, shape index: {}]   ;;  %s2051_s3 = inlined_call_operand.vmem [shape: f32[1,128], index: 3, kind: input, shape index: {}]   ;;  %s2052_s4 = inlined_call_operand.vmem [shape: f32[2,32], index: 4, kind: input, shape index: {}]   ;;  %s2053_s5 = inlined_call_operand.hbm [shape: f32[32,32], index: 5, kind: input, shape index: {}]   ;;  %s2054_s6 = inlined_call_operand.hbm [shape: f32[32,32], index: 6, kind: input, shape index: {}]   ;;  %s2055_s7 = inlined_call_operand.vmem [shape: f32[1,32], index: 7, kind: input, shape index: {}]   ;;  %s2056_s8 = inlined_call_operand.hbm [shape: f32[32,32], index: 8, kind: input, shape index: {}]   ;;  %s2057_s9 = inlined_call_operand.vmem [shape: f32[1,32], index: 9, kind: input, shape index: {}]   ;;  %s2058_s10 = inlined_call_operand.hbm [shape: f32[2,32], index: 10, kind: output, shape index: {}]  }
   0x1   :  { %16 = vsyncpa [#allocation6], 0 }
   0x2   :  { %17 = vsyncpa [#allocation9], 0 }
   0x3   :  { %18 = vsyncpa [#allocation12], 0 }
   0x4   :  { %19 = vsyncpa [#allocation4], 0  ;;  %s1766_s13 = smov [#allocation5]   ;;  %s1767_s15 = smov [#allocation8]  }
   0x5   :  { %s37_s14 = sshll.u32 %s1766_s13, 4  ;;  %s65_s16 = sshll.u32 %s1767_s15, 4  ;;  %s38_s14 = int_to_ptr.vmem [resolvable:$true] %s37_s14  ;;  %s66_s16 = int_to_ptr.vmem [resolvable:$true] %s65_s16 }
   0x6   :  { %s1624_s17 = scalar_lea.vmem %s38_s14, 1536  ;;  %p1629_p1 = scmp.lt.s32.totalorder %s38_s14, %s38_s14 }
   0x7   :  { %p1625_p0 = scmp.ne.s32.totalorder %s38_s14, %s1624_s17  ;;  %p1630_p2 = scmp.lt.s32.totalorder %s1624_s17, %s1624_s17 }
   0x9   :  { %p1631_p3 = por %p1630_p2, %p1629_p1 }
   0xb   :  { %p1632_p4 = pnand %p1631_p3, %p1625_p0 }
   0xd   :  { %1635 = shalt.err (!%p1632_p4)
}
   0xe   :  { %s1768_s18 = smov 128   ;;  %s1769_s19 = smov 8  }
   0xf   :  { %43 = dma.hbm_to_vmem [thread:$0]  %s2049_s1, 1536, %s38_s14, [#allocation6], %s1768_s18, %s1768_s18, %s1769_s19  }
  0x10   :  { %s1644_s22 = scalar_lea.vmem %s66_s16, 512  ;;  %p1649_p6 = scmp.lt.s32.totalorder %s66_s16, %s66_s16 }
  0x11   :  { %p1645_p5 = scmp.ne.s32.totalorder %s66_s16, %s1644_s22  ;;  %p1650_p7 = scmp.lt.s32.totalorder %s1644_s22, %s1644_s22 }
  0x13   :  { %p1651_p8 = por %p1650_p7, %p1649_p6 }
  0x15   :  { %p1652_p9 = pnand %p1651_p8, %p1645_p5 }
  0x17   :  { %1655 = shalt.err (!%p1652_p9)
}
  0x18   :  { %71 = dma.hbm_to_vmem [thread:$0]  %s2053_s5, 512, %s66_s16, [#allocation9], %s1768_s18, %s1768_s18, %s1769_s19  }
  0x19   :  { %s1770_s25 = smov [#allocation2]   ;;  %s1771_s27 = smov [#allocation7]  }
  0x1a   :  { %s25_s26 = sshll.u32 %s1770_s25, 4  ;;  %s49_s28 = sshll.u32 %s1771_s27, 4  ;;  %s26_s26 = int_to_ptr.vmem [resolvable:$true] %s25_s26  ;;  %s50_s28 = int_to_ptr.vmem [resolvable:$true] %s49_s28 }
  0x1b   :  { %s1664_s1 = scalar_lea.vmem %s26_s26, 256  ;;  %p1669_p11 = scmp.lt.s32.totalorder %s26_s26, %s26_s26 }
  0x1c   :  { %p1665_p10 = scmp.ne.s32.totalorder %s26_s26, %s1664_s1  ;;  %p1670_p12 = scmp.lt.s32.totalorder %s1664_s1, %s1664_s1 }
  0x1e   :  { %p1671_p13 = por %p1670_p12, %p1669_p11 }
  0x20   :  { %p1672_p0 = pnand %p1671_p13, %p1665_p10 }
  0x22   :  { %1675 = shalt.err (!%p1672_p0)
}
  0x23   :  { %31 = dma.hbm_to_vmem [thread:$0]  %s2048_s0, 256, %s26_s26, [#allocation3], %s1768_s18, %s1768_s18, %s1769_s19  }
  0x24   :  { %s1684_s5 = scalar_lea.vmem %s50_s28, 512  ;;  %p1689_p2 = scmp.lt.s32.totalorder %s50_s28, %s50_s28 }
  0x25   :  { %p1685_p1 = scmp.ne.s32.totalorder %s50_s28, %s1684_s5  ;;  %p1690_p3 = scmp.lt.s32.totalorder %s1684_s5, %s1684_s5 }
  0x27   :  { %p1691_p4 = por %p1690_p3, %p1689_p2 }
  0x29   :  { %p1692_p5 = pnand %p1691_p4, %p1685_p1 }
  0x2b   :  { %1695 = shalt.err (!%p1692_p5)
}
  0x2c   :  { %55 = dma.hbm_to_vmem [thread:$0]  %s2050_s2, 512, %s50_s28, [#allocation6], %s1768_s18, %s1768_s18, %s1769_s19  }
  0x2d   :  { %s1772_s13 = smov [#allocation10]   ;;  %s1773_s15 = smov [#allocation11]  }
  0x2e   :  { %s77_s14 = sshll.u32 %s1772_s13, 4  ;;  %s91_s16 = sshll.u32 %s1773_s15, 4  ;;  %s78_s14 = int_to_ptr.vmem [resolvable:$true] %s77_s14  ;;  %s92_s16 = int_to_ptr.vmem [resolvable:$true] %s91_s16 }
  0x2f   :  { %s1704_s0 = scalar_lea.vmem %s78_s14, 512  ;;  %p1709_p7 = scmp.lt.s32.totalorder %s78_s14, %s78_s14 }
  0x30   :  { %p1705_p6 = scmp.ne.s32.totalorder %s78_s14, %s1704_s0  ;;  %p1710_p8 = scmp.lt.s32.totalorder %s1704_s0, %s1704_s0 }
  0x32   :  { %p1711_p9 = por %p1710_p8, %p1709_p7 }
  0x34   :  { %p1712_p10 = pnand %p1711_p9, %p1705_p6 }
  0x36   :  { %1715 = shalt.err (!%p1712_p10)
}
  0x37   :  { %83 = dma.hbm_to_vmem [thread:$0]  %s2054_s6, 512, %s78_s14, [#allocation9], %s1768_s18, %s1768_s18, %s1769_s19  }
  0x38   :  { %s1724_s2 = scalar_lea.vmem %s92_s16, 512  ;;  %p1729_p12 = scmp.lt.s32.totalorder %s92_s16, %s92_s16 }
  0x39   :  { %p1725_p11 = scmp.ne.s32.totalorder %s92_s16, %s1724_s2  ;;  %p1730_p13 = scmp.lt.s32.totalorder %s1724_s2, %s1724_s2 }
  0x3b   :  { %p1731_p0 = por %p1730_p13, %p1729_p12 }
  0x3d   :  { %p1732_p1 = pnand %p1731_p0, %p1725_p11 }
  0x3f   :  { %1735 = shalt.err (!%p1732_p1)
}
  0x40   :  { %97 = dma.hbm_to_vmem [thread:$0]  %s2056_s8, 512, %s92_s16, [#allocation12], %s1768_s18, %s1768_s18, %s1769_s19  }
  0x41   :  { %1756 = dma.done.wait [#allocation3], 256  }
  0x42   :  { %1757 = vsyncadd [#allocation3], 4294967040 }
  0x43   :  { %1758 = dma.done.wait [#allocation6], 2048  }
  0x44   :  { %1759 = vsyncadd [#allocation6], 4294965248 }
  0x45   :  { %1760 = dma.done.wait [#allocation9], 1024  }
  0x46   :  { %1761 = vsyncadd [#allocation9], 4294966272 }
  0x47   :  { %1762 = dma.done.wait [#allocation12], 512  }
  0x48   :  { %1763 = vsyncadd [#allocation12], 4294966784  ;;  %v1774_v0 = vmov 0.0   ;;  %vm1775_vm0 = vmmov 0   ;;  %v131_v1 = vld [vmem:[#allocation5 + $0x58] sm:$0xff]  ;;  %v130_v2 = vld [vmem:[#allocation5 + $0x50] sm:$0xff] }
  0x49   :  { %1434 = vmatprep.subr.mxu1 %v1774_v0  ;;  %1442 = vmatprep.mubr.msk.f32.mxu1 %vm1775_vm0, %v1774_v0  ;;  %v129_v3 = vld [vmem:[#allocation5 + $0x48] sm:$0xff]  ;;  %v1873_v4 = vld [vmem:[#allocation7 + $0x18] sm:$0xff]  ;;  %v128_v5 = vld [vmem:[#allocation5 + $0x40] sm:$0xff]  ;;  %vm139_vm1 = vcmask 785408   ;;  %s1776_s18 = smov 64   ;;  %vm225_vm2 = vcmask 261120  }
  0x4a   :  { %1407 = vmatprep.subr.mxu0 %v131_v1  ;;  %1435 = vmatpush3.msra.mxu1 %v1873_v4  ;;  %v1876_v6 = vld [vmem:[#allocation7 + $0x10] sm:$0xff]  ;;  %v127_v8 = vld [vmem:[#allocation5 + $0x38] sm:$0xff]  ;;  %v1880_v9 = vld [vmem:[#allocation7 + $0x8] sm:$0xff]  ;;  %s1778_s27 = smov [#allocation13]   ;;  %vm1303_vm3 = vcmask 254976  }
  0x4b   :  { %1408 = vmatpush3.msra.mxu0 %v131_v1  ;;  %1436 = vmatprep.subr.mxu1 %v1774_v0  ;;  %v118_v7 = vld [vmem:[#allocation2] sm:$0xff]  ;;  %v1884_v11 = vld [vmem:[#allocation7] sm:$0xff]  ;;  %v125_v12 = vld [vmem:[#allocation5 + $0x28] sm:$0xff]  ;;  %s1311_s28 = sshll.u32 %s1778_s27, 4  ;;  %s1312_s28 = int_to_ptr.vmem [resolvable:$true] %s1311_s28 }
  0x4c   :  { %1409 = vmatprep.subr.mxu0 %v130_v2  ;;  %1437 = vmatpush3.msra.mxu1 %v1876_v6  ;;  %v126_v10 = vld [vmem:[#allocation5 + $0x30] sm:$0xff]  ;;  %v124_v13 = vld [vmem:[#allocation5 + $0x20] sm:$0xff]  ;;  %v123_v14 = vld [vmem:[#allocation5 + $0x18] sm:$0xff]  ;;  %s1736_s1 = scalar_lea.vmem %s1312_s28, 32  ;;  %p1741_p3 = scmp.lt.s32.totalorder %s1312_s28, %s1312_s28 }
  0x4d   :  { %1410 = vmatpush3.msra.mxu0 %v130_v2  ;;  %1438 = vmatprep.subr.mxu1 %v1774_v0  ;;  %v122_v15 = vld [vmem:[#allocation5 + $0x10] sm:$0xff]  ;;  %v121_v16 = vld [vmem:[#allocation5 + $0x8] sm:$0xff]  ;;  %v120_v17 = vld [vmem:[#allocation5] sm:$0xff]  ;;  %p1737_p2 = scmp.ne.s32.totalorder %s1312_s28, %s1736_s1  ;;  %p1742_p4 = scmp.lt.s32.totalorder %s1736_s1, %s1736_s1 }
  0x4e   :  { %1411 = vmatprep.subr.mxu0 %v129_v3  ;;  %1431 = vmatprep.mubr.msk.f32.mxu0 %vm139_vm1, %v118_v7  ;;  %v119_v18 = vld [vmem:[#allocation2 + $0x8] sm:$0xff]  ;;  %v1323_v21 = vld [vmem:[%s2051_s3] ss:$0 sm:$0xff]  ;;  %s1777_s3 = smov 32  }
  0x4f   :  { %1412 = vmatpush3.msra.mxu0 %v129_v3  ;;  %1439 = vmatpush3.msra.mxu1 %v1880_v9  ;;  %p1743_p5 = por %p1742_p4, %p1741_p3 }
  0x50   :  { %1413 = vmatprep.subr.mxu0 %v128_v5  ;;  %1440 = vmatprep.subr.mxu1 %v1774_v0 }
  0x51   :  { %1414 = vmatpush3.msra.mxu0 %v128_v5  ;;  %1441 = vmatpush3.msra.mxu1 %v1884_v11  ;;  %p1744_p6 = pnand %p1743_p5, %p1737_p2 }
  0x52   :  { %1415 = vmatprep.subr.mxu0 %v127_v8  ;;  %1443 = vmatmul.mubr.f32.vlgmr.msra.gmra.mxu1 %v1774_v0 }
  0x53   :  { %1416 = vmatpush3.msra.mxu0 %v127_v8  ;;  %1445 = vmatprep.subr.mxu1 %v1774_v0 }
  0x54   :  { %1417 = vmatprep.subr.mxu0 %v126_v10  ;;  %1446 = vmatpush3.msra.mxu1 %v1873_v4 }
  0x55   :  { %1418 = vmatpush3.msra.mxu0 %v126_v10  ;;  %1447 = vmatprep.subr.mxu1 %v1774_v0 }
  0x56   :  { %1419 = vmatprep.subr.mxu0 %v125_v12  ;;  %1448 = vmatpush3.msra.mxu1 %v1876_v6 }
  0x57   :  { %1420 = vmatpush3.msra.mxu0 %v125_v12  ;;  %1449 = vmatprep.subr.mxu1 %v1774_v0 }
  0x58   :  { %1421 = vmatprep.subr.mxu0 %v124_v13  ;;  %1450 = vmatpush3.msra.mxu1 %v1880_v9 }
  0x59   :  { %1422 = vmatpush3.msra.mxu0 %v124_v13  ;;  %1451 = vmatprep.subr.mxu1 %v1774_v0 }
  0x5a   :  { %1423 = vmatprep.subr.mxu0 %v123_v14  ;;  %1452 = vmatpush3.msra.mxu1 %v1884_v11 }
  0x5b   :  { %1424 = vmatpush3.msra.mxu0 %v123_v14  ;;  %1453 = vmatprep.mubr.msk.f32.mxu1 %vm1775_vm0, %v1774_v0 }
  0x5c   :  { %1425 = vmatprep.subr.mxu0 %v122_v15  ;;  %1456 = vmatprep.subr.mxu1 %v1774_v0 }
  0x5d   :  { %1426 = vmatpush3.msra.mxu0 %v122_v15 }
  0x5e   :  { %1427 = vmatprep.subr.mxu0 %v121_v16 }
  0x5f   :  { %1428 = vmatpush3.msra.mxu0 %v121_v16 }
  0x60   :  { %1429 = vmatprep.subr.mxu0 %v120_v17 }
  0x61   :  { %1430 = vmatpush3.msra.mxu0 %v120_v17 }
  0x62   :  { %1432 = vmatmul.mubr.msk.f32.vlgmr.msra.gmra.mxu0 %vm139_vm1, %v119_v18  ;;  %1467 = vmatprep.subr.mxu0 %v1774_v0 }
  0x63   :  { %1468 = vmatpush3.msra.mxu0 %v1873_v4  ;;  %1475 = vmatprep.mubr.msk.f32.mxu0 %vm1775_vm0, %v1774_v0 }
  0x64   :  { %1469 = vmatprep.subr.mxu0 %v1774_v0 }
  0x65   :  { %1470 = vmatpush3.msra.mxu0 %v1876_v6 }
  0x66   :  { %1471 = vmatprep.subr.mxu0 %v1774_v0 }
  0x67   :  { %1472 = vmatpush3.msra.mxu0 %v1880_v9 }
  0x68   :  { %1473 = vmatprep.subr.mxu0 %v1774_v0 }
  0x69   :  { %1474 = vmatpush3.msra.mxu0 %v1884_v11 }
  0x6a   :  { %1489 = vmatprep.subr.mxu0 %v1774_v0 }
 0x112   :  { %v295_v19 = vpop.f32.mrf.mxu1 }
 0x114   :  { %v1444_v20 = vpop.f32.mrf.mxu1 }
 0x122   :  { %v1433_v22 = vpop.f32.mrf.mxu0 }
 0x123   :  { %v1916_v23 = vadd.f32 %v1433_v22, %v1323_v21 }
 0x124   :  { %v212_v24 = vpop.f32.mrf.mxu0 }
 0x125   :  { %v1918_v25 = vadd.f32 %v1323_v21, %v212_v24 }
 0x127   :  { %v299_v26 = vadd.f32 %v295_v19, %v1918_v25 }
 0x129   :  { %1568 = vtanh.f32 %v299_v26  ;;  %v300_v28 = vmul.f32 0.5, %v299_v26 }
 0x12b   :  { %1570 = vtanh.f32 %v300_v28 }
 0x136   :  { %v1569_v27 = vpop.eup %1568 }
 0x137   :  { %307 = vrot.lane.b32.xlu0 %v1569_v27, %s1776_s18 }
 0x138   :  { %v1571_v29 = vpop.eup %1570 }
 0x139   :  { %v302_v30 = vadd.f32 1.0, %v1571_v29 }
 0x13b   :  { %v303_v31 = vmul.f32 0.5, %v302_v30 }
 0x13d   :  { %v305_v34 = vmul.f32 0.0, %v303_v31 }
 0x1a9   :  { %v308_v32 = vpop.permute.xlu0 %307 }
 0x1aa   :  { %v310_v33 = vmul.f32 %v308_v32, %v303_v31 }
 0x1ac   :  { %312 = vrot.lane.b32.xlu0 %v310_v33, %s1777_s3 }
 0x21e   :  { %v313_v35 = vpop.permute.xlu0 %312 }
 0x21f   :  { %v315_v36 = vadd.f32 %v313_v35, %v305_v34 }
 0x221   :  { %1572 = vtanh.f32 %v315_v36  ;;  %v407_v52 = vrot.slane %v315_v36, 6 }
 0x22e   :  { %v1573_v37 = vpop.eup %1572 }
 0x22f   :  { %318 = vrot.lane.b32.xlu1 %v1573_v37, %s1776_s18 }
 0x2a1   :  { %v319_v38 = vpop.permute.xlu1 %318 }
 0x2a2   :  { %v321_v39 = vmul.f32 %v319_v38, %v303_v31 }
 0x2a4   :  { %323 = vrot.lane.b32.xlu1 %v321_v39, %s1777_s3 }
 0x316   :  { %v324_v40 = vpop.permute.xlu1 %323 }
 0x317   :  { %1454 = vmatmul.mubr.msk.f32.vlgmr.msra.gmra.mxu1 %vm225_vm2, %v324_v40 }
 0x318   :  { %1457 = vmatpush3.msra.mxu1 %v1873_v4  ;;  %1464 = vmatprep.mubr.msk.f32.mxu1 %vm1775_vm0, %v1774_v0 }
 0x319   :  { %1458 = vmatprep.subr.mxu1 %v1774_v0 }
 0x31a   :  { %1459 = vmatpush3.msra.mxu1 %v1876_v6 }
 0x31b   :  { %1460 = vmatprep.subr.mxu1 %v1774_v0 }
 0x31c   :  { %1461 = vmatpush3.msra.mxu1 %v1880_v9 }
 0x31d   :  { %1462 = vmatprep.subr.mxu1 %v1774_v0 }
 0x31e   :  { %1463 = vmatpush3.msra.mxu1 %v1884_v11 }
 0x31f   :  { %1478 = vmatprep.subr.mxu1 %v1774_v0 }
 0x3d7   :  { %v393_v41 = vpop.f32.mrf.mxu1 }
 0x3d8   :  { %v398_v42 = vrot.slane %v393_v41, 6 }
 0x3d9   :  { %v1455_v43 = vpop.f32.mrf.mxu1 }
 0x3da   :  { %v400_v44 = vadd.f32 %v398_v42, %v1918_v25 }
 0x3dc   :  { %1574 = vtanh.f32 %v400_v44  ;;  %v401_v46 = vmul.f32 0.5, %v400_v44 }
 0x3de   :  { %1576 = vtanh.f32 %v401_v46 }
 0x3e9   :  { %v1575_v45 = vpop.eup %1574 }
 0x3ea   :  { %411 = vrot.lane.b32.xlu0 %v1575_v45, %s1776_s18 }
 0x3eb   :  { %v1577_v47 = vpop.eup %1576 }
 0x3ec   :  { %v403_v48 = vadd.f32 1.0, %v1577_v47 }
 0x3ee   :  { %v404_v49 = vmul.f32 0.5, %v403_v48 }
 0x3f0   :  { %v409_v53 = vmul.f32 %v407_v52, %v404_v49 }
 0x45c   :  { %v412_v50 = vpop.permute.xlu0 %411 }
 0x45d   :  { %v414_v51 = vmul.f32 %v412_v50, %v404_v49 }
 0x45f   :  { %416 = vrot.lane.b32.xlu1 %v414_v51, %s1777_s3 }
 0x4d1   :  { %v417_v54 = vpop.permute.xlu1 %416 }
 0x4d2   :  { %v419_v55 = vadd.f32 %v417_v54, %v409_v53 }
 0x4d4   :  { %1578 = vtanh.f32 %v419_v55  ;;  %v512_v13 = vrot.slane %v419_v55, 6 }
 0x4e1   :  { %v1579_v56 = vpop.eup %1578 }
 0x4e2   :  { %422 = vrot.lane.b32.xlu0 %v1579_v56, %s1776_s18 }
 0x554   :  { %v423_v57 = vpop.permute.xlu0 %422 }
 0x555   :  { %v425_v58 = vmul.f32 %v423_v57, %v404_v49 }
 0x557   :  { %v427_v59 = vrot.slane %v425_v58, 2 }
 0x559   :  { %428 = vrot.lane.b32.xlu1 %v427_v59, %s1777_s3 }
 0x5cb   :  { %v429_v60 = vpop.permute.xlu1 %428 }
 0x5cc   :  { %1465 = vmatmul.mubr.msk.f32.vlgmr.msra.gmra.mxu1 %vm225_vm2, %v429_v60 }
 0x5cd   :  { %1479 = vmatpush3.msra.mxu1 %v1873_v4  ;;  %1486 = vmatprep.mubr.msk.f32.mxu1 %vm1775_vm0, %v1774_v0 }
 0x5ce   :  { %1480 = vmatprep.subr.mxu1 %v1774_v0 }
 0x5cf   :  { %1481 = vmatpush3.msra.mxu1 %v1876_v6 }
 0x5d0   :  { %1482 = vmatprep.subr.mxu1 %v1774_v0 }
 0x5d1   :  { %1483 = vmatpush3.msra.mxu1 %v1880_v9 }
 0x5d2   :  { %1484 = vmatprep.subr.mxu1 %v1774_v0 }
 0x5d3   :  { %1485 = vmatpush3.msra.mxu1 %v1884_v11 }
 0x5d4   :  { %1500 = vmatprep.subr.mxu1 %v1774_v0 }
 0x68c   :  { %v498_v61 = vpop.f32.mrf.mxu1 }
 0x68d   :  { %v503_v62 = vrot.slane %v498_v61, 4 }
 0x68e   :  { %v1466_v63 = vpop.f32.mrf.mxu1 }
 0x68f   :  { %v505_v1 = vadd.f32 %v503_v62, %v1918_v25 }
 0x691   :  { %1580 = vtanh.f32 %v505_v1  ;;  %v506_v3 = vmul.f32 0.5, %v505_v1 }
 0x693   :  { %1582 = vtanh.f32 %v506_v3 }
 0x69e   :  { %v1581_v2 = vpop.eup %1580 }
 0x69f   :  { %516 = vrot.lane.b32.xlu0 %v1581_v2, %s1776_s18 }
 0x6a0   :  { %v1583_v5 = vpop.eup %1582 }
 0x6a1   :  { %v508_v7 = vadd.f32 1.0, %v1583_v5 }
 0x6a3   :  { %v509_v8 = vmul.f32 0.5, %v508_v7 }
 0x6a5   :  { %v514_v14 = vmul.f32 %v512_v13, %v509_v8 }
 0x711   :  { %v517_v10 = vpop.permute.xlu0 %516 }
 0x712   :  { %v519_v12 = vmul.f32 %v517_v10, %v509_v8 }
 0x714   :  { %521 = vrot.lane.b32.xlu1 %v519_v12, %s1777_s3 }
 0x786   :  { %v522_v15 = vpop.permute.xlu1 %521 }
 0x787   :  { %v524_v16 = vadd.f32 %v522_v15, %v514_v14 }
 0x789   :  { %1584 = vtanh.f32 %v524_v16  ;;  %v617_v35 = vrot.slane %v524_v16, 6 }
 0x796   :  { %v1585_v17 = vpop.eup %1584 }
 0x797   :  { %527 = vrot.lane.b32.xlu0 %v1585_v17, %s1776_s18 }
 0x809   :  { %v528_v18 = vpop.permute.xlu0 %527 }
 0x80a   :  { %v530_v19 = vmul.f32 %v528_v18, %v509_v8 }
 0x80c   :  { %v532_v20 = vrot.slane %v530_v19, 4 }
 0x80e   :  { %533 = vrot.lane.b32.xlu1 %v532_v20, %s1777_s3 }
 0x880   :  { %v534_v21 = vpop.permute.xlu1 %533 }
 0x881   :  { %1476 = vmatmul.mubr.msk.f32.vlgmr.msra.gmra.mxu0 %vm225_vm2, %v534_v21 }
 0x882   :  { %1490 = vmatpush3.msra.mxu0 %v1873_v4  ;;  %1497 = vmatprep.mubr.msk.f32.mxu0 %vm1775_vm0, %v1774_v0 }
 0x883   :  { %1491 = vmatprep.subr.mxu0 %v1774_v0 }
 0x884   :  { %1492 = vmatpush3.msra.mxu0 %v1876_v6 }
 0x885   :  { %1493 = vmatprep.subr.mxu0 %v1774_v0 }
 0x886   :  { %1494 = vmatpush3.msra.mxu0 %v1880_v9 }
 0x887   :  { %1495 = vmatprep.subr.mxu0 %v1774_v0 }
 0x888   :  { %1496 = vmatpush3.msra.mxu0 %v1884_v11 }
 0x889   :  { %1511 = vmatprep.subr.mxu0 %v1774_v0 }
 0x941   :  { %v603_v22 = vpop.f32.mrf.mxu0 }
 0x942   :  { %v608_v24 = vrot.slane %v603_v22, 2 }
 0x943   :  { %v1477_v26 = vpop.f32.mrf.mxu0 }
 0x944   :  { %v610_v27 = vadd.f32 %v608_v24, %v1918_v25 }
 0x946   :  { %1586 = vtanh.f32 %v610_v27  ;;  %v611_v29 = vmul.f32 0.5, %v610_v27 }
 0x948   :  { %1588 = vtanh.f32 %v611_v29 }
 0x953   :  { %v1587_v28 = vpop.eup %1586 }
 0x954   :  { %621 = vrot.lane.b32.xlu0 %v1587_v28, %s1776_s18 }
 0x955   :  { %v1589_v30 = vpop.eup %1588 }
 0x956   :  { %v613_v31 = vadd.f32 1.0, %v1589_v30 }
 0x958   :  { %v614_v32 = vmul.f32 0.5, %v613_v31 }
 0x95a   :  { %v619_v36 = vmul.f32 %v617_v35, %v614_v32 }
 0x9c6   :  { %v622_v33 = vpop.permute.xlu0 %621 }
 0x9c7   :  { %v624_v34 = vmul.f32 %v622_v33, %v614_v32 }
 0x9c9   :  { %626 = vrot.lane.b32.xlu1 %v624_v34, %s1777_s3 }
 0xa3b   :  { %v627_v37 = vpop.permute.xlu1 %626 }
 0xa3c   :  { %v629_v38 = vadd.f32 %v627_v37, %v619_v36 }
 0xa3e   :  { %1590 = vtanh.f32 %v629_v38  ;;  %v719_v53 = vrot.slane %v629_v38, 6 }
 0xa4b   :  { %v1591_v39 = vpop.eup %1590 }
 0xa4c   :  { %632 = vrot.lane.b32.xlu0 %v1591_v39, %s1776_s18 }
 0xabe   :  { %v633_v25 = vpop.permute.xlu0 %632 }
 0xabf   :  { %v635_v40 = vmul.f32 %v633_v25, %v614_v32 }
 0xac1   :  { %v637_v41 = vrot.slane %v635_v40, 6 }
 0xac3   :  { %638 = vrot.lane.b32.xlu1 %v637_v41, %s1777_s3 }
 0xb35   :  { %v639_v42 = vpop.permute.xlu1 %638 }
 0xb36   :  { %1487 = vmatmul.mubr.msk.f32.vlgmr.msra.gmra.mxu1 %vm225_vm2, %v639_v42 }
 0xb37   :  { %1501 = vmatpush3.msra.mxu1 %v1873_v4  ;;  %1508 = vmatprep.mubr.msk.f32.mxu1 %vm1775_vm0, %v1774_v0 }
 0xb38   :  { %1502 = vmatprep.subr.mxu1 %v1774_v0 }
 0xb39   :  { %1503 = vmatpush3.msra.mxu1 %v1876_v6 }
 0xb3a   :  { %1504 = vmatprep.subr.mxu1 %v1774_v0 }
 0xb3b   :  { %1505 = vmatpush3.msra.mxu1 %v1880_v9 }
 0xb3c   :  { %1506 = vmatprep.subr.mxu1 %v1774_v0 }
 0xb3d   :  { %1507 = vmatpush3.msra.mxu1 %v1884_v11 }
 0xb3e   :  { %1522 = vmatprep.subr.mxu1 %v1774_v0 }
 0xbf6   :  { %v708_v43 = vpop.f32.mrf.mxu1 }
 0xbf7   :  { %v712_v44 = vadd.f32 %v708_v43, %v1916_v23 }
 0xbf8   :  { %v1488_v45 = vpop.f32.mrf.mxu1 }
 0xbf9   :  { %1592 = vtanh.f32 %v712_v44  ;;  %v713_v47 = vmul.f32 0.5, %v712_v44 }
 0xbfb   :  { %1594 = vtanh.f32 %v713_v47 }
 0xc06   :  { %v1593_v46 = vpop.eup %1592 }
 0xc07   :  { %723 = vrot.lane.b32.xlu0 %v1593_v46, %s1776_s18 }
 0xc08   :  { %v1595_v48 = vpop.eup %1594 }
 0xc09   :  { %v715_v49 = vadd.f32 1.0, %v1595_v48 }
 0xc0b   :  { %v716_v50 = vmul.f32 0.5, %v715_v49 }
 0xc0d   :  { %v721_v54 = vmul.f32 %v719_v53, %v716_v50 }
 0xc79   :  { %v724_v51 = vpop.permute.xlu0 %723 }
 0xc7a   :  { %v726_v52 = vmul.f32 %v724_v51, %v716_v50 }
 0xc7c   :  { %728 = vrot.lane.b32.xlu1 %v726_v52, %s1777_s3 }
 0xcee   :  { %v729_v55 = vpop.permute.xlu1 %728 }
 0xcef   :  { %v731_v56 = vadd.f32 %v729_v55, %v721_v54  ;;  %v1060_v54 = vld [vmem:[#allocation10 + $0x18] sm:$0xff] }
 0xcf0   :  { %v1055_v55 = vld [vmem:[#allocation8 + $0x18] sm:$0xff] }
 0xcf1   :  { %1596 = vtanh.f32 %v731_v56 }
 0xcfe   :  { %v1597_v57 = vpop.eup %1596 }
 0xcff   :  { %734 = vrot.lane.b32.xlu0 %v1597_v57, %s1776_s18  ;;  %v1058_v57 = vld [vmem:[#allocation10 + $0x8] sm:$0xff] }
 0xd71   :  { %v735_v58 = vpop.permute.xlu0 %734 }
 0xd72   :  { %v737_v59 = vmul.f32 %v735_v58, %v716_v50  ;;  %v1053_v58 = vld [vmem:[#allocation8 + $0x8] sm:$0xff] }
 0xd74   :  { %739 = vrot.lane.b32.xlu1 %v737_v59, %s1777_s3  ;;  %v1057_v59 = vld [vmem:[#allocation10] sm:$0xff] }
 0xde6   :  { %v740_v60 = vpop.permute.xlu1 %739 }
 0xde7   :  { %1498 = vmatmul.mubr.msk.f32.vlgmr.msra.gmra.mxu0 %vm225_vm2, %v740_v60  ;;  %v1052_v60 = vld [vmem:[#allocation8] sm:$0xff] }
 0xde8   :  { %1512 = vmatpush3.msra.mxu0 %v1873_v4  ;;  %1519 = vmatprep.mubr.msk.f32.mxu0 %vm1775_vm0, %v1774_v0 }
 0xde9   :  { %1513 = vmatprep.subr.mxu0 %v1774_v0 }
 0xdea   :  { %1514 = vmatpush3.msra.mxu0 %v1876_v6 }
 0xdeb   :  { %1515 = vmatprep.subr.mxu0 %v1774_v0 }
 0xdec   :  { %1516 = vmatpush3.msra.mxu0 %v1880_v9 }
 0xded   :  { %1517 = vmatprep.subr.mxu0 %v1774_v0 }
 0xdee   :  { %1518 = vmatpush3.msra.mxu0 %v1884_v11  ;;  %v823_v11 = vrot.slane %v731_v56, 6  ;;  %v1054_v56 = vld [vmem:[#allocation8 + $0x10] sm:$0xff] }
 0xdef   :  { %1533 = vmatprep.subr.mxu0 %v1774_v0 }
 0xea7   :  { %v809_v61 = vpop.f32.mrf.mxu0 }
 0xea8   :  { %v814_v62 = vrot.slane %v809_v61, 6  ;;  %v1056_v61 = vld [vmem:[%s2052_s4] sm:$0x3] }
 0xea9   :  { %v1499_v4 = vpop.f32.mrf.mxu0 }
 0xeaa   :  { %v816_v63 = vadd.f32 %v814_v62, %v1916_v23 }
 0xeac   :  { %1598 = vtanh.f32 %v816_v63  ;;  %v817_v6 = vmul.f32 0.5, %v816_v63 }
 0xeae   :  { %1600 = vtanh.f32 %v817_v6 }
 0xeb9   :  { %v1599_v1 = vpop.eup %1598 }
 0xeba   :  { %827 = vrot.lane.b32.xlu0 %v1599_v1, %s1776_s18 }
 0xebb   :  { %v1601_v2 = vpop.eup %1600 }
 0xebc   :  { %v819_v3 = vadd.f32 1.0, %v1601_v2 }
 0xebe   :  { %v820_v9 = vmul.f32 0.5, %v819_v3 }
 0xec0   :  { %v825_v8 = vmul.f32 %v823_v11, %v820_v9  ;;  %v1219_v11 = vld [vmem:[#allocation11] sm:$0xff] }
 0xf2c   :  { %v828_v5 = vpop.permute.xlu0 %827 }
 0xf2d   :  { %v830_v7 = vmul.f32 %v828_v5, %v820_v9  ;;  %v1221_v5 = vld [vmem:[#allocation11 + $0x10] sm:$0xff] }
 0xf2f   :  { %832 = vrot.lane.b32.xlu1 %v830_v7, %s1777_s3  ;;  %v1220_v7 = vld [vmem:[#allocation11 + $0x8] sm:$0xff] }
 0xfa1   :  { %v833_v10 = vpop.permute.xlu1 %832 }
 0xfa2   :  { %v835_v12 = vadd.f32 %v833_v10, %v825_v8  ;;  %v1335_v10 = vld [vmem:[%s2055_s7] ss:$0 sm:$0xff] }
 0xfa4   :  { %1602 = vtanh.f32 %v835_v12  ;;  %v928_v31 = vrot.slane %v835_v12, 6 }
 0xfb1   :  { %v1603_v13 = vpop.eup %1602 }
 0xfb2   :  { %838 = vrot.lane.b32.xlu0 %v1603_v13, %s1776_s18 }
0x1024   :  { %v839_v14 = vpop.permute.xlu0 %838 }
0x1025   :  { %v841_v15 = vmul.f32 %v839_v14, %v820_v9  ;;  %v1222_v9 = vld [vmem:[#allocation11 + $0x18] sm:$0xff] }
0x1027   :  { %v843_v16 = vrot.slane %v841_v15, 2 }
0x1029   :  { %844 = vrot.lane.b32.xlu1 %v843_v16, %s1777_s3  ;;  %v1336_v16 = vld [vmem:[%s2057_s9] ss:$0 sm:$0xff] }
0x109b   :  { %v845_v17 = vpop.permute.xlu1 %844 }
0x109c   :  { %1509 = vmatmul.mubr.msk.f32.vlgmr.msra.gmra.mxu1 %vm225_vm2, %v845_v17 }
0x109d   :  { %1530 = vmatprep.mubr.msk.f32.mxu1 %vm1775_vm0, %v1774_v0  ;;  %1523 = vmatpush3.msra.mxu1 %v1060_v54 }
0x109e   :  { %1524 = vmatprep.subr.mxu1 %v1774_v0 }
0x115c   :  { %v914_v18 = vpop.f32.mrf.mxu1 }
0x115d   :  { %v919_v19 = vrot.slane %v914_v18, 4 }
0x115e   :  { %v1510_v20 = vpop.f32.mrf.mxu1 }
0x115f   :  { %v921_v21 = vadd.f32 %v919_v19, %v1916_v23 }
0x1161   :  { %1604 = vtanh.f32 %v921_v21  ;;  %v922_v24 = vmul.f32 0.5, %v921_v21 }
0x1163   :  { %1606 = vtanh.f32 %v922_v24 }
0x116e   :  { %v1605_v22 = vpop.eup %1604 }
0x116f   :  { %932 = vrot.lane.b32.xlu0 %v1605_v22, %s1776_s18 }
0x1170   :  { %v1607_v26 = vpop.eup %1606 }
0x1171   :  { %v924_v27 = vadd.f32 1.0, %v1607_v26 }
0x1173   :  { %v925_v28 = vmul.f32 0.5, %v924_v27 }
0x1175   :  { %v930_v32 = vmul.f32 %v928_v31, %v925_v28 }
0x11e1   :  { %v933_v29 = vpop.permute.xlu0 %932 }
0x11e2   :  { %v935_v30 = vmul.f32 %v933_v29, %v925_v28 }
0x11e4   :  { %937 = vrot.lane.b32.xlu1 %v935_v30, %s1777_s3 }
0x1256   :  { %v938_v33 = vpop.permute.xlu1 %937 }
0x1257   :  { %v940_v34 = vadd.f32 %v938_v33, %v930_v32 }
0x1259   :  { %1608 = vtanh.f32 %v940_v34  ;;  %v1033_v50 = vrot.slane %v940_v34, 6 }
0x1266   :  { %v1609_v35 = vpop.eup %1608 }
0x1267   :  { %943 = vrot.lane.b32.xlu0 %v1609_v35, %s1776_s18 }
0x12d9   :  { %v944_v36 = vpop.permute.xlu0 %943 }
0x12da   :  { %v946_v37 = vmul.f32 %v944_v36, %v925_v28 }
0x12dc   :  { %v948_v38 = vrot.slane %v946_v37, 4 }
0x12de   :  { %949 = vrot.lane.b32.xlu1 %v948_v38, %s1777_s3 }
0x1350   :  { %v950_v39 = vpop.permute.xlu1 %949 }
0x1351   :  { %1520 = vmatmul.mubr.msk.f32.vlgmr.msra.gmra.mxu0 %vm225_vm2, %v950_v39 }
0x1352   :  { %1541 = vmatprep.mubr.msk.f32.mxu0 %vm1775_vm0, %v1774_v0  ;;  %1534 = vmatpush3.msra.mxu0 %v1055_v55 }
0x1353   :  { %1535 = vmatprep.subr.mxu0 %v1774_v0 }
0x1354   :  { %1536 = vmatpush3.msra.mxu0 %v1054_v56 }
0x1355   :  { %1537 = vmatprep.subr.mxu0 %v1774_v0 }
0x1356   :  { %1538 = vmatpush3.msra.mxu0 %v1053_v58 }
0x1357   :  { %1539 = vmatprep.subr.mxu0 %v1774_v0 }
0x1358   :  { %1540 = vmatpush3.msra.mxu0 %v1052_v60 }
0x1411   :  { %v1019_v25 = vpop.f32.mrf.mxu0 }
0x1412   :  { %v1024_v40 = vrot.slane %v1019_v25, 2 }
0x1413   :  { %v1521_v41 = vpop.f32.mrf.mxu0 }
0x1414   :  { %v1026_v42 = vadd.f32 %v1024_v40, %v1916_v23  ;;  %v1059_v23 = vld [vmem:[#allocation10 + $0x10] sm:$0xff] }
0x1415   :  { %1525 = vmatpush3.msra.mxu1 %v1059_v23 }
0x1416   :  { %1610 = vtanh.f32 %v1026_v42  ;;  %v1027_v44 = vmul.f32 0.5, %v1026_v42  ;;  %1526 = vmatprep.subr.mxu1 %v1774_v0 }
0x1417   :  { %1527 = vmatpush3.msra.mxu1 %v1058_v57 }
0x1418   :  { %1612 = vtanh.f32 %v1027_v44  ;;  %1528 = vmatprep.subr.mxu1 %v1774_v0 }
0x1419   :  { %1529 = vmatpush3.msra.mxu1 %v1057_v59 }
0x141a   :  { %1531 = vmatmul.mubr.msk.f32.vlgmr.msra.gmra.mxu1 %vm225_vm2, %v1056_v61  ;;  %1544 = vmatprep.subr.mxu1 %v1774_v0 }
0x141b   :  { %1552 = vmatprep.mubr.msk.f32.mxu1 %vm1775_vm0, %v1774_v0  ;;  %1545 = vmatpush3.msra.mxu1 %v1222_v9 }
0x141c   :  { %1546 = vmatprep.subr.mxu1 %v1774_v0 }
0x141d   :  { %1547 = vmatpush3.msra.mxu1 %v1221_v5 }
0x141e   :  { %1548 = vmatprep.subr.mxu1 %v1774_v0 }
0x141f   :  { %1549 = vmatpush3.msra.mxu1 %v1220_v7 }
0x1420   :  { %1550 = vmatprep.subr.mxu1 %v1774_v0 }
0x1421   :  { %1551 = vmatpush3.msra.mxu1 %v1219_v11 }
0x1423   :  { %v1611_v43 = vpop.eup %1610 }
0x1424   :  { %1037 = vrot.lane.b32.xlu0 %v1611_v43, %s1776_s18 }
0x1425   :  { %v1613_v45 = vpop.eup %1612 }
0x1426   :  { %v1029_v46 = vadd.f32 1.0, %v1613_v45 }
0x1428   :  { %v1030_v47 = vmul.f32 0.5, %v1029_v46 }
0x142a   :  { %v1035_v51 = vmul.f32 %v1033_v50, %v1030_v47 }
0x1496   :  { %v1038_v48 = vpop.permute.xlu0 %1037 }
0x1497   :  { %v1040_v49 = vmul.f32 %v1038_v48, %v1030_v47 }
0x1499   :  { %1042 = vrot.lane.b32.xlu1 %v1040_v49, %s1777_s3 }
0x14da   :  { %v1130_v6 = vpop.f32.mrf.mxu1 }
0x14dc   :  { %v1532_v2 = vpop.f32.mrf.mxu1 }
0x150b   :  { %v1043_v52 = vpop.permute.xlu1 %1042 }
0x150c   :  { %v1045_v53 = vadd.f32 %v1043_v52, %v1035_v51 }
0x150e   :  { %1614 = vtanh.f32 %v1045_v53 }
0x151b   :  { %v1615_v62 = vpop.eup %1614 }
0x151c   :  { %1048 = vrot.lane.b32.xlu0 %v1615_v62, %s1776_s18 }
0x158e   :  { %v1049_v4 = vpop.permute.xlu0 %1048 }
0x158f   :  { %v1051_v63 = vmul.f32 %v1049_v4, %v1030_v47 }
0x1591   :  { %v1135_v1 = vrot.slane %v1051_v63, 6 }
0x1593   :  { %1136 = vrot.lane.b32.xlu1 %v1135_v1, %s1777_s3 }
0x1605   :  { %v1137_v3 = vpop.permute.xlu1 %1136 }
0x1606   :  { %1542 = vmatmul.mubr.msk.f32.vlgmr.msra.gmra.mxu0 %vm225_vm2, %v1137_v3 }
0x16c6   :  { %v1206_v8 = vpop.f32.mrf.mxu0 }
0x16c7   :  { %v1207_v12 = vadd.f32 %v1206_v8, %v1130_v6 }
0x16c8   :  { %v1543_v13 = vpop.f32.mrf.mxu0 }
0x16c9   :  { %v1217_v14 = vadd.f32 %v1335_v10, %v1207_v12 }
0x16cb   :  { %v1218_v15 = vmax.f32 %v1217_v14, 0.0 }
0x16cd   :  { %1553 = vmatmul.mubr.msk.f32.vlgmr.msra.gmra.mxu1 %vm225_vm2, %v1218_v15 }
0x178d   :  { %v1299_v0 = vpop.f32.mrf.mxu1 }
0x178e   :  { %v1300_v17 = vadd.f32 %v1336_v16, %v1299_v0 }
0x178f   :  { %v1554_v18 = vpop.f32.mrf.mxu1 }
0x1790   :  { %1304 = vst.msk [vmem:[#allocation13] sm:$0x3] %vm1303_vm3, %v1300_v17 }
0x1791   :  { %1747 = shalt.err (!%p1744_p6)
}
0x1792   :  { %1314 = dma.vmem_to_hbm [thread:$0]  %s1312_s28, 32, %s2058_s10, [#allocation4]  }
0x1793   :  { %1764 = dma.done.wait [#allocation4], 32  }
0x1794   :  { %1765 = vsyncadd [#allocation4], 4294967264 }
0x1795   :  { %1318 = vsyncpa [#allocation3], 1 }
0x1796   :  { %1319 = vsyncpa [#allocation6], 1 }
0x1797   :  { %1320 = vsyncpa [#allocation9], 1 }
0x1798   :  { %1321 = vsyncpa [#allocation12], 1 }
0x1799   :  { %1322 = vsyncpa [#allocation4], 1 }

</bundles_post_ra>
